<compile_context>
chip_gen: v6e
topology: v6e:2x2x1
jax: 0.10.0
libtpu: 0.0.40
codegen_flags: <defaults>
</compile_context>

<pallas_src>
import functools
import math

import jax
import jax.numpy as jnp
from jax import lax
from jax.experimental import pallas as pl
from jax.experimental.pallas import tpu as pltpu


def _round_up(x: int, m: int) -> int:
    return ((x + m - 1) // m) * m


def _noisy_linear_kernel(x_ref, wmu_ref, wsig_ref, eps_out_col_ref, eps_in_row_ref,
                         bmu_ref, bsig_ref, beps_ref, o_ref, acc_ref,
                         *, compute_dtype):
    k = pl.program_id(1)

    @pl.when(k == 0)
    def _():
        acc_ref[...] = jnp.zeros_like(acc_ref)

    # Factorized noise built on the VPU: weps_tile = eps_out (tn,1) * eps_in (1,tk).
    # Weight construction stays in f32 for accuracy.
    w = wmu_ref[...] + wsig_ref[...] * (eps_out_col_ref[...] * eps_in_row_ref[...])
    x = x_ref[...]
    if compute_dtype is not None:
        x = x.astype(compute_dtype)
        w = w.astype(compute_dtype)

    # Contract x dim 1 (K) with w dim 1 (K): MXU consumes the (tn, tk) weight
    # tile directly, no transpose.
    acc_ref[...] += lax.dot_general(
        x, w,
        dimension_numbers=(((1,), (1,)), ((), ())),
        preferred_element_type=jnp.float32)

    @pl.when(k == pl.num_programs(1) - 1)
    def _():
        b = bmu_ref[...] + bsig_ref[...] * beps_ref[...]          # (1, tn) f32
        o_ref[...] = (acc_ref[...] + b).astype(o_ref.dtype)


def noisy_linear(x, weight_mu, weight_sigma, bias_mu, bias_sigma,
                 eps_in, eps_out, *, compute_dtype=None,
                 tn_target=512, tk_target=512):
    """NoisyLinear forward. eps_in/eps_out are the factorized noise vectors
    (weight_epsilon == outer(eps_out, eps_in), bias_epsilon == eps_out)."""
    B, in_f = x.shape
    out_f, in_f2 = weight_mu.shape
    assert in_f == in_f2

    # Lane-dense, (8,128)-aligned padded shapes & tile sizes.
    tn = min(tn_target, _round_up(out_f, 128))
    tk = min(tk_target, _round_up(in_f, 128))
    out_p = _round_up(out_f, tn)
    in_p = _round_up(in_f, tk)
    b_p = _round_up(B, 8)

    f32 = jnp.float32

    def pad2(a, rows, cols):
        a = a.astype(f32)
        return jnp.pad(a, ((0, rows - a.shape[0]), (0, cols - a.shape[1])))

    x_p = pad2(x, b_p, in_p)
    wmu_p = pad2(weight_mu, out_p, in_p)
    wsig_p = pad2(weight_sigma, out_p, in_p)
    eps_out_col = pad2(eps_out.reshape(out_f, 1), out_p, 1)
    eps_in_row = pad2(eps_in.reshape(1, in_f), 1, in_p)
    bmu_p = pad2(bias_mu.reshape(1, out_f), 1, out_p)
    bsig_p = pad2(bias_sigma.reshape(1, out_f), 1, out_p)
    beps_p = pad2(eps_out.reshape(1, out_f), 1, out_p)

    grid = (out_p // tn, in_p // tk)

    # VMEM budget: double-buffered input/output tiles + f32 accumulator + slack.
    tile_bytes = 4 * (b_p * tk            # x tile
                      + 2 * tn * tk       # weight_mu + weight_sigma tiles
                      + tn + tk + 3 * tn  # eps / bias vectors
                      + b_p * tn)         # output tile
    vmem_limit = min(100 * 1024 * 1024,
                     max(16 * 1024 * 1024,
                         2 * tile_bytes + 4 * b_p * tn + (4 << 20)))

    kernel = functools.partial(_noisy_linear_kernel, compute_dtype=compute_dtype)

    y_p = pl.pallas_call(
        kernel,
        out_shape=jax.ShapeDtypeStruct((b_p, out_p), x.dtype),
        grid_spec=pltpu.PrefetchScalarGridSpec(
            num_scalar_prefetch=0,
            grid=grid,
            in_specs=[
                pl.BlockSpec((b_p, tk), lambda j, k: (0, k)),   # x
                pl.BlockSpec((tn, tk), lambda j, k: (j, k)),    # weight_mu
                pl.BlockSpec((tn, tk), lambda j, k: (j, k)),    # weight_sigma
                pl.BlockSpec((tn, 1), lambda j, k: (j, 0)),     # eps_out (column)
                pl.BlockSpec((1, tk), lambda j, k: (0, k)),     # eps_in (row)
                pl.BlockSpec((1, tn), lambda j, k: (0, j)),     # bias_mu
                pl.BlockSpec((1, tn), lambda j, k: (0, j)),     # bias_sigma
                pl.BlockSpec((1, tn), lambda j, k: (0, j)),     # bias_epsilon
            ],
            out_specs=pl.BlockSpec((b_p, tn), lambda j, k: (0, j)),
            scratch_shapes=[pltpu.VMEM((b_p, tn), jnp.float32)],
        ),
        compiler_params=pltpu.CompilerParams(
            dimension_semantics=("parallel", "arbitrary"),
            vmem_limit_bytes=int(vmem_limit),
        ),
    )(x_p, wmu_p, wsig_p, eps_out_col, eps_in_row, bmu_p, bsig_p, beps_p)

    return y_p[:B, :out_f]


def _scale_noise(key, features):
    x = jax.random.normal(key, (features,), dtype=jnp.float32)
    return jnp.sign(x) * jnp.sqrt(jnp.abs(x))


def make_noisy_linear_params(key, in_features, out_features, sigma=0.5):
    k_wmu, k_bmu, k_ein, k_eout = jax.random.split(key, 4)
    mu_range = 1.0 / math.sqrt(in_features)

    weight_mu = jax.random.uniform(
        k_wmu, (out_features, in_features), minval=-mu_range, maxval=mu_range,
        dtype=jnp.float32)
    bias_mu = jax.random.uniform(
        k_bmu, (out_features,), minval=-mu_range, maxval=mu_range,
        dtype=jnp.float32)
    weight_sigma = jnp.full((out_features, in_features),
                            sigma / math.sqrt(in_features), dtype=jnp.float32)
    bias_sigma = jnp.full((out_features,),
                          sigma / math.sqrt(out_features), dtype=jnp.float32)

    # Factorized Gaussian noise (reset_noise) -- kept factorized; the kernel
    # reconstructs weight_epsilon = outer(eps_out, eps_in) on the fly.
    eps_in = _scale_noise(k_ein, in_features)
    eps_out = _scale_noise(k_eout, out_features)

    return weight_mu, bias_mu, weight_sigma, bias_sigma, eps_in, eps_out


def _reference(x, wmu, wsig, bmu, bsig, eps_in, eps_out):
    weight_epsilon = jnp.outer(eps_out, eps_in)
    bias_epsilon = eps_out
    w = wmu + wsig * weight_epsilon
    b = bmu + bsig * bias_epsilon
    return x @ w.T + b


if __name__ == "__main__":
    key = jax.random.PRNGKey(0)

    # Test 1: module-implied small shapes (single-tile grid).
    k_params, k_x, k_params2, k_x2 = jax.random.split(key, 4)
    batch, in_features, out_features = 8, 32, 64
    wmu, bmu, wsig, bsig, eps_in, eps_out = make_noisy_linear_params(
        k_params, in_features, out_features, sigma=0.5)
    x = jax.random.normal(k_x, (batch, in_features), dtype=jnp.float32)

    y = noisy_linear(x, wmu, wsig, bmu, bsig, eps_in, eps_out)
    y = jax.block_until_ready(y)
    y_ref = _reference(x, wmu, wsig, bmu, bsig, eps_in, eps_out)
    assert y.shape == (batch, out_features)
    assert jnp.allclose(y, y_ref, atol=1e-5, rtol=1e-5), "test 1 mismatch"

    # Test 2: exercises the (N, K) grid + accumulator (multi-tile, small tiles).
    batch2, in2, out2 = 4, 256, 384
    wmu2, bmu2, wsig2, bsig2, eps_in2, eps_out2 = make_noisy_linear_params(
        k_params2, in2, out2, sigma=0.5)
    x2 = jax.random.normal(k_x2, (batch2, in2), dtype=jnp.float32)

    y2 = noisy_linear(x2, wmu2, wsig2, bmu2, bsig2, eps_in2, eps_out2,
                      tn_target=128, tk_target=128)
    y2 = jax.block_until_ready(y2)
    y2_ref = _reference(x2, wmu2, wsig2, bmu2, bsig2, eps_in2, eps_out2)
    assert y2.shape == (batch2, out2)
    assert jnp.allclose(y2, y2_ref, atol=1e-4, rtol=1e-5), "test 2 mismatch"

    print("KERNEL_OK")
</pallas_src>

<mosaic_0001>
module attributes {stable_mosaic.version = 11 : i64} {
  func.func @_noisy_linear_kernel(%arg0: i32, %arg1: i32, %arg2: memref<8x128xf32, #tpu.memory_space<vmem>>, %arg3: memref<128x128xf32, #tpu.memory_space<vmem>>, %arg4: memref<128x128xf32, #tpu.memory_space<vmem>>, %arg5: memref<128x1xf32, #tpu.memory_space<vmem>>, %arg6: memref<1x128xf32, #tpu.memory_space<vmem>>, %arg7: memref<1x128xf32, #tpu.memory_space<vmem>>, %arg8: memref<1x128xf32, #tpu.memory_space<vmem>>, %arg9: memref<1x128xf32, #tpu.memory_space<vmem>>, %arg10: memref<8x128xf32, #tpu.memory_space<vmem>>, %arg11: memref<8x128xf32, #tpu.memory_space<vmem>>) attributes {dimension_semantics = [#tpu.dimension_semantics<parallel>, #tpu.dimension_semantics<arbitrary>], iteration_bounds = array<i64: 1, 1>, scalar_prefetch = 0 : i64, scratch_operands = 1 : i64, tpu.core_type = #tpu.core_type<tc>, window_params = [{transform_indices = @transform_0, window_bounds = array<i64: 8, 128>}, {transform_indices = @transform_1, window_bounds = array<i64: 128, 128>}, {transform_indices = @transform_2, window_bounds = array<i64: 128, 128>}, {transform_indices = @transform_3, window_bounds = array<i64: 128, 1>}, {transform_indices = @transform_4, window_bounds = array<i64: 1, 128>}, {transform_indices = @transform_5, window_bounds = array<i64: 1, 128>}, {transform_indices = @transform_6, window_bounds = array<i64: 1, 128>}, {transform_indices = @transform_7, window_bounds = array<i64: 1, 128>}, {transform_indices = @transform_8, window_bounds = array<i64: 8, 128>}]} {
    %c0_i32 = arith.constant 0 : i32
    %0 = arith.cmpi eq, %arg1, %c0_i32 : i32
    %1 = arith.extui %0 : i1 to i32
    %c0_i32_0 = arith.constant 0 : i32
    %2 = arith.cmpi ne, %1, %c0_i32_0 : i32
    scf.if %2 {
      %cst_16 = arith.constant 0.000000e+00 : f32
      %20 = vector.broadcast %cst_16 : f32 to vector<8x128xf32>
      %c0_17 = arith.constant 0 : index
      %c0_18 = arith.constant 0 : index
      %21 = vector.load %arg11[%c0_17, %c0_18] : memref<8x128xf32, #tpu.memory_space<vmem>>, vector<8x128xf32>
      tpu.vector_store %arg11[%c0_17, %c0_18], %20 {strides = array<i32>} : memref<8x128xf32, #tpu.memory_space<vmem>>, vector<8x128xf32>,
    } else {
    }
    %c0 = arith.constant 0 : index
    %c0_1 = arith.constant 0 : index
    %3 = vector.load %arg3[%c0, %c0_1] : memref<128x128xf32, #tpu.memory_space<vmem>>, vector<128x128xf32>
    %c0_2 = arith.constant 0 : index
    %c0_3 = arith.constant 0 : index
    %4 = vector.load %arg4[%c0_2, %c0_3] : memref<128x128xf32, #tpu.memory_space<vmem>>, vector<128x128xf32>
    %c0_4 = arith.constant 0 : index
    %c0_5 = arith.constant 0 : index
    %5 = vector.load %arg5[%c0_4, %c0_5] : memref<128x1xf32, #tpu.memory_space<vmem>>, vector<128x1xf32>
    %c0_6 = arith.constant 0 : index
    %c0_7 = arith.constant 0 : index
    %6 = vector.load %arg6[%c0_6, %c0_7] : memref<1x128xf32, #tpu.memory_space<vmem>>, vector<1x128xf32>
    %7 = vector.broadcast %5 : vector<128x1xf32> to vector<128x128xf32>
    %8 = vector.broadcast %6 : vector<1x128xf32> to vector<128x128xf32>
    %9 = arith.mulf %7, %8 : vector<128x128xf32>
    %10 = arith.mulf %4, %9 : vector<128x128xf32>
    %11 = arith.addf %3, %10 : vector<128x128xf32>
    %c0_8 = arith.constant 0 : index
    %c0_9 = arith.constant 0 : index
    %12 = vector.load %arg2[%c0_8, %c0_9] : memref<8x128xf32, #tpu.memory_space<vmem>>, vector<8x128xf32>
    %c0_10 = arith.constant 0 : index
    %c0_11 = arith.constant 0 : index
    %13 = vector.load %arg11[%c0_10, %c0_11] : memref<8x128xf32, #tpu.memory_space<vmem>>, vector<8x128xf32>
    %cst = arith.constant dense<0.000000e+00> : vector<8x128xf32>
    %14 = tpu.matmul %12, %11, %cst {dimension_numbers = #tpu.dot_dimension_numbers<[1], [1], [0], [0], [0, 0, 1, 0], [], []>} : vector<8x128xf32>, vector<128x128xf32>, vector<8x128xf32> -> vector<8x128xf32>
    %15 = arith.addf %13, %14 : vector<8x128xf32>
    %c0_12 = arith.constant 0 : index
    %c0_13 = arith.constant 0 : index
    %16 = vector.load %arg11[%c0_12, %c0_13] : memref<8x128xf32, #tpu.memory_space<vmem>>, vector<8x128xf32>
    tpu.vector_store %arg11[%c0_12, %c0_13], %15 {strides = array<i32>} : memref<8x128xf32, #tpu.memory_space<vmem>>, vector<8x128xf32>,
    %c0_i32_14 = arith.constant 0 : i32
    %17 = arith.cmpi eq, %arg1, %c0_i32_14 : i32
    %18 = arith.extui %17 : i1 to i32
    %c0_i32_15 = arith.constant 0 : i32
    %19 = arith.cmpi ne, %18, %c0_i32_15 : i32
    scf.if %19 {
      %c0_16 = arith.constant 0 : index
      %c0_17 = arith.constant 0 : index
      %20 = vector.load %arg7[%c0_16, %c0_17] : memref<1x128xf32, #tpu.memory_space<vmem>>, vector<1x128xf32>
      %c0_18 = arith.constant 0 : index
      %c0_19 = arith.constant 0 : index
      %21 = vector.load %arg8[%c0_18, %c0_19] : memref<1x128xf32, #tpu.memory_space<vmem>>, vector<1x128xf32>
      %c0_20 = arith.constant 0 : index
      %c0_21 = arith.constant 0 : index
      %22 = vector.load %arg9[%c0_20, %c0_21] : memref<1x128xf32, #tpu.memory_space<vmem>>, vector<1x128xf32>
      %23 = arith.mulf %21, %22 : vector<1x128xf32>
      %24 = arith.addf %20, %23 : vector<1x128xf32>
      %c0_22 = arith.constant 0 : index
      %c0_23 = arith.constant 0 : index
      %25 = vector.load %arg11[%c0_22, %c0_23] : memref<8x128xf32, #tpu.memory_space<vmem>>, vector<8x128xf32>
      %26 = vector.broadcast %24 : vector<1x128xf32> to vector<8x128xf32>
      %27 = arith.addf %25, %26 : vector<8x128xf32>
      %c0_24 = arith.constant 0 : index
      %c0_25 = arith.constant 0 : index
      %28 = vector.load %arg10[%c0_24, %c0_25] : memref<8x128xf32, #tpu.memory_space<vmem>>, vector<8x128xf32>
      tpu.vector_store %arg10[%c0_24, %c0_25], %27 {strides = array<i32>} : memref<8x128xf32, #tpu.memory_space<vmem>>, vector<8x128xf32>,
    } else {
    }
    return
  }
  func.func @transform_0(%arg0: i32, %arg1: i32) -> (i32, i32) {
    %c0_i32 = arith.constant 0 : i32
    %c0_i32_0 = arith.constant 0 : i32
    return %c0_i32, %arg1 : i32, i32
  }
  func.func @transform_1(%arg0: i32, %arg1: i32) -> (i32, i32) {
    %c0_i32 = arith.constant 0 : i32
    return %arg0, %arg1 : i32, i32
  }
  func.func @transform_2(%arg0: i32, %arg1: i32) -> (i32, i32) {
    %c0_i32 = arith.constant 0 : i32
    return %arg0, %arg1 : i32, i32
  }
  func.func @transform_3(%arg0: i32, %arg1: i32) -> (i32, i32) {
    %c0_i32 = arith.constant 0 : i32
    %c0_i32_0 = arith.constant 0 : i32
    return %arg0, %c0_i32 : i32, i32
  }
  func.func @transform_4(%arg0: i32, %arg1: i32) -> (i32, i32) {
    %c0_i32 = arith.constant 0 : i32
    %c0_i32_0 = arith.constant 0 : i32
    return %c0_i32, %arg1 : i32, i32
  }
  func.func @transform_5(%arg0: i32, %arg1: i32) -> (i32, i32) {
    %c0_i32 = arith.constant 0 : i32
    %c0_i32_0 = arith.constant 0 : i32
    return %c0_i32, %arg0 : i32, i32
  }
  func.func @transform_6(%arg0: i32, %arg1: i32) -> (i32, i32) {
    %c0_i32 = arith.constant 0 : i32
    %c0_i32_0 = arith.constant 0 : i32
    return %c0_i32, %arg0 : i32, i32
  }
  func.func @transform_7(%arg0: i32, %arg1: i32) -> (i32, i32) {
    %c0_i32 = arith.constant 0 : i32
    %c0_i32_0 = arith.constant 0 : i32
    return %c0_i32, %arg0 : i32, i32
  }
  func.func @transform_8(%arg0: i32, %arg1: i32) -> (i32, i32) {
    %c0_i32 = arith.constant 0 : i32
    %c0_i32_0 = arith.constant 0 : i32
    return %c0_i32, %arg0 : i32, i32
  }
}

</mosaic_0001>

<bundles_post_ra>
// kernel: tpu_custom_call.1
= control target key start
LH: loop header
LB: loop body
LE: loop exit
PB: predicated region body
PF: predicated region fallthrough
CT: control target
= control target key end

     0   :  { %13 = vsyncpa [#allocation4], 0  ;;  %s685_s0 = inlined_call_operand.hbm [shape: f32[8,128], index: 0, kind: input, shape index: {}]   ;;  %s686_s1 = inlined_call_operand.vmem [shape: f32[128,128], index: 1, kind: input, shape index: {}]   ;;  %s687_s2 = inlined_call_operand.hbm [shape: f32[128,128], index: 2, kind: input, shape index: {}]   ;;  %s688_s3 = inlined_call_operand.vmem [shape: f32[128,1], index: 3, kind: input, shape index: {}]   ;;  %s689_s4 = inlined_call_operand.vmem [shape: f32[1,128], index: 4, kind: input, shape index: {}]   ;;  %s690_s5 = inlined_call_operand.vmem [shape: f32[1,128], index: 5, kind: input, shape index: {}]   ;;  %s691_s6 = inlined_call_operand.vmem [shape: f32[1,128], index: 6, kind: input, shape index: {}]   ;;  %s692_s7 = inlined_call_operand.vmem [shape: f32[1,128], index: 7, kind: input, shape index: {}]   ;;  %s693_s8 = inlined_call_operand.hbm [shape: f32[8,128], index: 8, kind: output, shape index: {}]  }
   0x1   :  { %14 = vsyncpa [#allocation7], 0 }
   0x2   :  { %15 = vsyncpa [#allocation5], 0  ;;  %s480_s27 = smov [#allocation3]   ;;  %s481_s29 = smov [#allocation6]  }
   0x3   :  { %s22_s28 = sshll.u32 %s480_s27, 4  ;;  %s33_s30 = sshll.u32 %s481_s29, 4  ;;  %s23_s28 = int_to_ptr.vmem [resolvable:$true] %s22_s28  ;;  %s34_s30 = int_to_ptr.vmem [resolvable:$true] %s33_s30 }
   0x4   :  { %s422_s9 = scalar_lea.vmem %s23_s28, 128  ;;  %p427_p1 = scmp.lt.s32.totalorder %s23_s28, %s23_s28 }
   0x5   :  { %p423_p0 = scmp.ne.s32.totalorder %s23_s28, %s422_s9  ;;  %p428_p2 = scmp.lt.s32.totalorder %s422_s9, %s422_s9 }
   0x7   :  { %p429_p3 = por %p428_p2, %p427_p1 }
   0x9   :  { %p430_p4 = pnand %p429_p3, %p423_p0 }
   0xb   :  { %433 = shalt.err (!%p430_p4)
}
   0xc   :  { %25 = dma.hbm_to_vmem [thread:$0]  %s685_s0, 128, %s23_s28, [#allocation4]  }
   0xd   :  { %s442_s12 = scalar_lea.vmem %s34_s30, 2048  ;;  %p447_p6 = scmp.lt.s32.totalorder %s34_s30, %s34_s30 }
   0xe   :  { %p443_p5 = scmp.ne.s32.totalorder %s34_s30, %s442_s12  ;;  %p448_p7 = scmp.lt.s32.totalorder %s442_s12, %s442_s12 }
  0x10   :  { %p449_p8 = por %p448_p7, %p447_p6 }
  0x12   :  { %p450_p9 = pnand %p449_p8, %p443_p5 }
  0x14   :  { %453 = shalt.err (!%p450_p9)
}
  0x15   :  { %s482_s13 = smov 128   ;;  %s483_s14 = smov 8  }
  0x16   :  { %39 = dma.hbm_to_vmem [thread:$0]  %s687_s2, 2048, %s34_s30, [#allocation7], %s482_s13, %s482_s13, %s483_s14  }
  0x17   :  { %474 = dma.done.wait [#allocation4], 128  }
  0x18   :  { %475 = vsyncadd [#allocation4], 4294967168 }
  0x19   :  { %476 = dma.done.wait [#allocation7], 2048  }
  0x1a   :  { %477 = vsyncadd [#allocation7], 4294965248  ;;  %v484_v0 = vmov 0   ;;  %v108_v1 = vld [vmem:[%s688_s3 + $0x78] sm:$0xff]  ;;  %v106_v2 = vld [vmem:[%s688_s3 + $0x68] sm:$0xff]  ;;  %v485_v5 = vmov 0.0  }
  0x1b   :  { %413 = vset.pattern.permute.xlu1 %v484_v0  ;;  %412 = vset.pattern.permute.xlu0 %v484_v0  ;;  %v107_v3 = vld [vmem:[%s688_s3 + $0x70] sm:$0xff]  ;;  %v105_v4 = vld [vmem:[%s688_s3 + $0x60] sm:$0xff]  ;;  %v104_v6 = vld [vmem:[%s688_s3 + $0x58] sm:$0xff]  ;;  %vm486_vm0 = vmmov 0   ;;  %s487_s12 = smov [#allocation8]  }
  0x1c   :  { %187 = vperm.xlu0 %412, %v108_v1   ;;  %177 = vperm.xlu1 %413, %v106_v2   ;;  %v103_v7 = vld [vmem:[%s688_s3 + $0x50] sm:$0xff]  ;;  %v102_v8 = vld [vmem:[%s688_s3 + $0x48] sm:$0xff]  ;;  %v101_v9 = vld [vmem:[%s688_s3 + $0x40] sm:$0xff]  ;;  %s341_s13 = sshll.u32 %s487_s12, 4  ;;  %s342_s13 = int_to_ptr.vmem [resolvable:$true] %s341_s13 }
  0x1d   :  { %369 = vmatprep.subr.mxu0 %v485_v5  ;;  %v100_v10 = vld [vmem:[%s688_s3 + $0x38] sm:$0xff]  ;;  %v99_v11 = vld [vmem:[%s688_s3 + $0x30] sm:$0xff]  ;;  %v98_v12 = vld [vmem:[%s688_s3 + $0x28] sm:$0xff]  ;;  %401 = vmatprep.mubr.msk.f32.mxu0 %vm486_vm0, %v485_v5  ;;  %p459_p11 = scmp.lt.s32.totalorder %s342_s13, %s342_s13 }
  0x1e   :  { %v97_v13 = vld [vmem:[%s688_s3 + $0x20] sm:$0xff]  ;;  %v96_v14 = vld [vmem:[%s688_s3 + $0x18] sm:$0xff]  ;;  %v95_v15 = vld [vmem:[%s688_s3 + $0x10] sm:$0xff] }
  0x1f   :  { %v94_v16 = vld [vmem:[%s688_s3 + $0x8] sm:$0xff]  ;;  %v93_v17 = vld [vmem:[%s688_s3] sm:$0xff]  ;;  %v76_v23 = vld [vmem:[%s686_s1 + $0x78] sm:$0xff] }
  0x20   :  { %182 = vperm.xlu0 %412, %v107_v3   ;;  %172 = vperm.xlu1 %413, %v105_v4   ;;  %v592_v18 = vld [vmem:[%s689_s4] ss:$0 sm:$0xff]  ;;  %v90_v26 = vld [vmem:[#allocation6 + $0x68] sm:$0xff]  ;;  %v91_v28 = vld [vmem:[#allocation6 + $0x70] sm:$0xff] }
  0x21   :  { %v92_v20 = vld [vmem:[#allocation6 + $0x78] sm:$0xff]  ;;  %v75_v31 = vld [vmem:[%s686_s1 + $0x70] sm:$0xff]  ;;  %v74_v35 = vld [vmem:[%s686_s1 + $0x68] sm:$0xff] }
  0x22   :  { %v89_v38 = vld [vmem:[#allocation6 + $0x60] sm:$0xff]  ;;  %v88_v43 = vld [vmem:[#allocation6 + $0x58] sm:$0xff]  ;;  %v87_v49 = vld [vmem:[#allocation6 + $0x50] sm:$0xff] }
  0x23   :  { %v73_v45 = vld [vmem:[%s686_s1 + $0x60] sm:$0xff]  ;;  %v72_v51 = vld [vmem:[%s686_s1 + $0x58] sm:$0xff]  ;;  %v86_v55 = vld [vmem:[#allocation6 + $0x48] sm:$0xff] }
  0x24   :  { %167 = vperm.xlu0 %412, %v104_v6   ;;  %162 = vperm.xlu1 %413, %v103_v7   ;;  %v71_v57 = vld [vmem:[%s686_s1 + $0x50] sm:$0xff]  ;;  %v85_v61 = vld [vmem:[#allocation6 + $0x40] sm:$0xff]  ;;  %v84_v3 = vld [vmem:[#allocation6 + $0x38] sm:$0xff] }
  0x25   :  { %v70_v63 = vld [vmem:[%s686_s1 + $0x48] sm:$0xff]  ;;  %v69_v6 = vld [vmem:[%s686_s1 + $0x40] sm:$0xff] }
  0x28   :  { %157 = vperm.xlu0 %412, %v102_v8   ;;  %152 = vperm.xlu1 %413, %v101_v9  }
  0x2c   :  { %147 = vperm.xlu0 %412, %v100_v10   ;;  %142 = vperm.xlu1 %413, %v99_v11   ;;  %v83_v10 = vld [vmem:[#allocation6 + $0x30] sm:$0xff] }
  0x30   :  { %137 = vperm.xlu0 %412, %v98_v12   ;;  %132 = vperm.xlu1 %413, %v97_v13   ;;  %v68_v12 = vld [vmem:[%s686_s1 + $0x38] sm:$0xff] }
  0x34   :  { %127 = vperm.xlu0 %412, %v96_v14   ;;  %122 = vperm.xlu1 %413, %v95_v15  }
  0x38   :  { %117 = vperm.xlu0 %412, %v94_v16   ;;  %112 = vperm.xlu1 %413, %v93_v17   ;;  %v82_v16 = vld [vmem:[#allocation6 + $0x28] sm:$0xff] }
  0x97   :  { %v188_v19 = vpop.permute.xlu0 %187  ;;  %v178_v22 = vpop.permute.xlu1 %177 }
  0x98   :  { %v211_v21 = vmul.f32 %v592_v18, %v188_v19  ;;  %v209_v25 = vmul.f32 %v592_v18, %v178_v22  ;;  %v67_v19 = vld [vmem:[%s686_s1 + $0x30] sm:$0xff] }
  0x9a   :  { %v227_v24 = vmul.f32 %v211_v21, %v92_v20  ;;  %v225_v32 = vmul.f32 %v209_v25, %v90_v26  ;;  %v66_v25 = vld [vmem:[%s686_s1 + $0x28] sm:$0xff] }
  0x9b   :  { %v183_v27 = vpop.permute.xlu0 %182  ;;  %v173_v34 = vpop.permute.xlu1 %172 }
  0x9c   :  { %v210_v29 = vmul.f32 %v592_v18, %v183_v27  ;;  %v243_v30 = vadd.f32 %v227_v24, %v76_v23  ;;  %v208_v36 = vmul.f32 %v592_v18, %v173_v34  ;;  %v241_v40 = vadd.f32 %v225_v32, %v74_v35  ;;  %v81_v23 = vld [vmem:[#allocation6 + $0x20] sm:$0xff]  ;;  %v79_v35 = vld [vmem:[#allocation6 + $0x10] sm:$0xff] }
  0x9e   :  { %v226_v33 = vmul.f32 %v210_v29, %v91_v28  ;;  %370 = vmatpush3.xpose.msra.mxu0 %v243_v30  ;;  %v224_v41 = vmul.f32 %v208_v36, %v89_v38  ;;  %v80_v29 = vld [vmem:[#allocation6 + $0x18] sm:$0xff] }
  0x9f   :  { %371 = vmatprep.subr.mxu0 %v485_v5  ;;  %v168_v39 = vpop.permute.xlu0 %167  ;;  %v163_v44 = vpop.permute.xlu1 %162 }
  0xa0   :  { %v242_v37 = vadd.f32 %v226_v33, %v75_v31  ;;  %v207_v42 = vmul.f32 %v592_v18, %v168_v39  ;;  %v206_v47 = vmul.f32 %v592_v18, %v163_v44  ;;  %v240_v48 = vadd.f32 %v224_v41, %v73_v45  ;;  %v65_v31 = vld [vmem:[%s686_s1 + $0x20] sm:$0xff]  ;;  %v78_v41 = vld [vmem:[#allocation6 + $0x8] sm:$0xff] }
  0xa2   :  { %372 = vmatpush3.xpose.msra.mxu0 %v242_v37  ;;  %v223_v46 = vmul.f32 %v207_v42, %v88_v43  ;;  %v222_v52 = vmul.f32 %v206_v47, %v87_v49  ;;  %v64_v37 = vld [vmem:[%s686_s1 + $0x18] sm:$0xff]  ;;  %v63_v43 = vld [vmem:[%s686_s1 + $0x10] sm:$0xff]  ;;  %v77_v47 = vld [vmem:[#allocation6] sm:$0xff] }
  0xa3   :  { %373 = vmatprep.subr.mxu0 %v485_v5  ;;  %v158_v50 = vpop.permute.xlu0 %157  ;;  %v153_v56 = vpop.permute.xlu1 %152 }
  0xa4   :  { %v205_v53 = vmul.f32 %v592_v18, %v158_v50  ;;  %v239_v54 = vadd.f32 %v223_v46, %v72_v51  ;;  %v204_v59 = vmul.f32 %v592_v18, %v153_v56  ;;  %v238_v60 = vadd.f32 %v222_v52, %v71_v57  ;;  %v61_v51 = vld [vmem:[%s686_s1] sm:$0xff] }
  0xa6   :  { %374 = vmatpush3.xpose.msra.mxu0 %v241_v40  ;;  %v221_v58 = vmul.f32 %v205_v53, %v86_v55  ;;  %v220_v0 = vmul.f32 %v204_v59, %v85_v61  ;;  %v328_v53 = vlaneseq  ;;  %v323_v55 = vld [vmem:[%s692_s7] sm:$0x1] }
  0xa7   :  { %375 = vmatprep.subr.mxu0 %v485_v5  ;;  %v148_v62 = vpop.permute.xlu0 %147  ;;  %v143_v4 = vpop.permute.xlu1 %142 }
  0xa8   :  { %v203_v1 = vmul.f32 %v592_v18, %v148_v62  ;;  %v237_v2 = vadd.f32 %v221_v58, %v70_v63  ;;  %v202_v8 = vmul.f32 %v592_v18, %v143_v4  ;;  %v236_v9 = vadd.f32 %v220_v0, %v69_v6  ;;  %v321_v58 = vld [vmem:[%s690_s5] sm:$0x1] }
  0xa9   :  { %v329_v57 = vshrl.u32 %v328_v53, 7 }
  0xaa   :  { %376 = vmatpush3.xpose.msra.mxu0 %v240_v48  ;;  %v219_v7 = vmul.f32 %v203_v1, %v84_v3  ;;  %v218_v13 = vmul.f32 %v202_v8, %v83_v10  ;;  %v62_v48 = vld [vmem:[%s686_s1 + $0x8] sm:$0xff] }
  0xab   :  { %377 = vmatprep.subr.mxu0 %v485_v5  ;;  %v138_v11 = vpop.permute.xlu0 %137  ;;  %v133_v17 = vpop.permute.xlu1 %132  ;;  %v330_v59 = vsub.s32 0, %v329_v57 }
  0xac   :  { %v201_v14 = vmul.f32 %v592_v18, %v138_v11  ;;  %v235_v15 = vadd.f32 %v219_v7, %v68_v12  ;;  %v200_v21 = vmul.f32 %v592_v18, %v133_v17  ;;  %v234_v22 = vadd.f32 %v218_v13, %v67_v19 }
  0xae   :  { %378 = vmatpush3.xpose.msra.mxu0 %v239_v54  ;;  %v217_v20 = vmul.f32 %v201_v14, %v82_v16  ;;  %v216_v26 = vmul.f32 %v200_v21, %v81_v23  ;;  %v322_v54 = vld [vmem:[%s691_s6] sm:$0x1]  ;;  %s454_s6 = scalar_lea.vmem %s342_s13, 128 }
  0xaf   :  { %379 = vmatprep.subr.mxu0 %v485_v5  ;;  %v128_v24 = vpop.permute.xlu0 %127  ;;  %v123_v30 = vpop.permute.xlu1 %122  ;;  %v324_v56 = vmul.f32 %v323_v55, %v322_v54  ;;  %p455_p10 = scmp.ne.s32.totalorder %s342_s13, %s454_s6  ;;  %p460_p12 = scmp.lt.s32.totalorder %s454_s6, %s454_s6 }
  0xb0   :  { %v199_v27 = vmul.f32 %v592_v18, %v128_v24  ;;  %v233_v28 = vadd.f32 %v217_v20, %v66_v25  ;;  %v198_v33 = vmul.f32 %v592_v18, %v123_v30  ;;  %v232_v34 = vadd.f32 %v216_v26, %v65_v31 }
  0xb1   :  { %p461_p13 = por %p460_p12, %p459_p11 }
  0xb2   :  { %380 = vmatpush3.xpose.msra.mxu0 %v238_v60  ;;  %v215_v32 = vmul.f32 %v199_v27, %v80_v29  ;;  %v214_v38 = vmul.f32 %v198_v33, %v79_v35 }
  0xb3   :  { %381 = vmatprep.subr.mxu0 %v485_v5  ;;  %v118_v36 = vpop.permute.xlu0 %117  ;;  %v113_v42 = vpop.permute.xlu1 %112  ;;  %p462_p0 = pnand %p461_p13, %p455_p10 }
  0xb4   :  { %v197_v39 = vmul.f32 %v592_v18, %v118_v36  ;;  %v231_v40 = vadd.f32 %v215_v32, %v64_v37  ;;  %v196_v45 = vmul.f32 %v592_v18, %v113_v42  ;;  %v230_v46 = vadd.f32 %v214_v38, %v63_v43  ;;  %v244_v18 = vld [vmem:[#allocation3] sm:$0xff] }
  0xb6   :  { %382 = vmatpush3.xpose.msra.mxu0 %v237_v2  ;;  %v213_v44 = vmul.f32 %v197_v39, %v78_v41  ;;  %v212_v49 = vmul.f32 %v196_v45, %v77_v47 }
  0xb7   :  { %383 = vmatprep.subr.mxu0 %v485_v5 }
  0xb8   :  { %v229_v50 = vadd.f32 %v213_v44, %v62_v48  ;;  %v228_v52 = vadd.f32 %v212_v49, %v61_v51 }
  0xba   :  { %384 = vmatpush3.xpose.msra.mxu0 %v236_v9 }
  0xbb   :  { %385 = vmatprep.subr.mxu0 %v485_v5 }
  0xbe   :  { %386 = vmatpush3.xpose.msra.mxu0 %v235_v15 }
  0xbf   :  { %387 = vmatprep.subr.mxu0 %v485_v5 }
  0xc2   :  { %388 = vmatpush3.xpose.msra.mxu0 %v234_v22 }
  0xc3   :  { %389 = vmatprep.subr.mxu0 %v485_v5 }
  0xc6   :  { %390 = vmatpush3.xpose.msra.mxu0 %v233_v28 }
  0xc7   :  { %391 = vmatprep.subr.mxu0 %v485_v5 }
  0xca   :  { %392 = vmatpush3.xpose.msra.mxu0 %v232_v34 }
  0xcb   :  { %393 = vmatprep.subr.mxu0 %v485_v5 }
  0xce   :  { %394 = vmatpush3.xpose.msra.mxu0 %v231_v40 }
  0xcf   :  { %395 = vmatprep.subr.mxu0 %v485_v5 }
  0xd2   :  { %396 = vmatpush3.xpose.msra.mxu0 %v230_v46 }
  0xd3   :  { %397 = vmatprep.subr.mxu0 %v485_v5 }
  0xd6   :  { %398 = vmatpush3.xpose.msra.mxu0 %v229_v50 }
  0xd7   :  { %399 = vmatprep.subr.mxu0 %v485_v5  ;;  %v325_v5 = vadd.f32 %v324_v56, %v321_v58 }
  0xd9   :  { %v331_v60 = vrot.slane %v325_v5, %v330_v59 }
  0xda   :  { %400 = vmatpush3.xpose.msra.mxu0 %v228_v52 }
  0xdd   :  { %402 = vmatmul.mubr.f32.vlgmr.msra.gmra.mxu0 %v244_v18 }
 0x19d   :  { %v312_v61 = vpop.f32.mrf.mxu0 }
 0x19e   :  { %v333_v62 = vadd.f32 %v331_v60, %v312_v61 }
 0x19f   :  { %v403_v63 = vpop.f32.mrf.mxu0 }
 0x1a0   :  { %334 = vst [vmem:[#allocation8] sm:$0xff] %v333_v62 }
 0x1a1   :  { %465 = shalt.err (!%p462_p0)
}
 0x1a2   :  { %344 = dma.vmem_to_hbm [thread:$0]  %s342_s13, 128, %s693_s8, [#allocation5]  }
 0x1a3   :  { %478 = dma.done.wait [#allocation5], 128  }
 0x1a4   :  { %479 = vsyncadd [#allocation5], 4294967168 }
 0x1a5   :  { %348 = vsyncpa [#allocation4], 1 }
 0x1a6   :  { %349 = vsyncpa [#allocation7], 1 }
 0x1a7   :  { %350 = vsyncpa [#allocation5], 1 }

</bundles_post_ra>
